<compile_context>
chip_gen: v7x
topology: tpu7x:2x2x1
jax: 0.10.0
libtpu: 0.0.40
codegen_flags: <defaults>
</compile_context>

<pallas_src>
import math

import jax
import jax.numpy as jnp
from jax import lax
from jax.experimental import pallas as pl
from jax.experimental.pallas import tpu as pltpu

BN_EPS = 1e-5
# Output rows per grid step.  Must be even (the 2-row halo block must land on a
# whole block index).  For production, size TH so TH*W is ~256-512 rows.
TH = 8
VMEM_LIMIT = 32 * 1024 * 1024   # tiny kernel; raise per-generation for big tiles


def _round_up(x, m):
    return (x + m - 1) // m * m


@jax.jit
def conv_bn_relu(x_nchw, weight_oihw, gamma, beta):
    """x_nchw: (N, Cin, H, W) f32; weight_oihw: (Cout, Cin, 3, 3) f32."""
    N, Cin, H, W = x_nchw.shape
    Cout, Cin2, KH, KW = weight_oihw.shape
    assert Cin2 == Cin and KH == 3 and KW == 3, "specialized to 3x3 / pad=1 / stride=1"

    Hp = _round_up(H, TH)          # pad H so row tiles are uniform
    num_h = Hp // TH
    Wp2 = W + 2                    # conv-padded width

    # ---- glue (XLA): NCHW -> NHWC, spatial pad (+1) and H tile pad, bf16 ----
    x_nhwc = jnp.transpose(x_nchw, (0, 2, 3, 1))                      # (N, H, W, Cin)
    xp = jnp.pad(x_nhwc, ((0, 0), (1, 1 + (Hp - H)), (1, 1), (0, 0)))  # (N, Hp+2, W+2, Cin)
    xp = xp.astype(jnp.bfloat16)

    # weight (Cout, Cin, 3, 3) -> (9, Cin, Cout) bf16, resident in VMEM.
    w_mat = jnp.transpose(weight_oihw, (2, 3, 1, 0)).reshape(KH * KW, Cin, Cout)
    w_mat = w_mat.astype(jnp.bfloat16)

    grid = (N, num_h)

    def conv_stats_kernel(xb_ref, xh_ref, w_ref, conv_ref, stats_ref, sum_acc, sq_acc):
        n = pl.program_id(0)
        h = pl.program_id(1)

        @pl.when((n == 0) & (h == 0))
        def _():
            sum_acc[...] = jnp.zeros_like(sum_acc)
            sq_acc[...] = jnp.zeros_like(sq_acc)

        # Halo'd input tile assembled in VMEM: (TH+2, W+2, Cin) bf16.
        xt = jnp.concatenate([xb_ref[...], xh_ref[...]], axis=0)

        # In-VMEM 3x3 unfold: nine shifted (TH*W, Cin) @ (Cin, Cout) matmuls,
        # f32 accumulation on the MXU.
        acc = jnp.zeros((TH * W, Cout), jnp.float32)
        for kh in range(KH):
            for kw in range(KW):
                patch = xt[kh:kh + TH, kw:kw + W, :].reshape(TH * W, Cin)
                acc = acc + jnp.dot(patch, w_ref[kh * KW + kw],
                                    preferred_element_type=jnp.float32)

        # bf16 intermediate (halves HBM traffic); stats below use the f32 acc.
        conv_ref[...] = acc.astype(conv_ref.dtype)

        # Per-channel sum / sum-of-squares (mask rows only if H was tile-padded;
        # zero-padded input rows still produce nonzero conv rows at the seam).
        stats_src = acc
        if H % TH != 0:
            row = h * TH + lax.broadcasted_iota(jnp.int32, (TH * W, 1), 0) // W
            stats_src = jnp.where(row < H, acc, 0.0)
        sum_acc[...] += jnp.sum(stats_src, axis=0, keepdims=True)
        sq_acc[...] += jnp.sum(stats_src * stats_src, axis=0, keepdims=True)

        @pl.when((n == pl.num_programs(0) - 1) & (h == pl.num_programs(1) - 1))
        def _():
            stats_ref[...] = jnp.concatenate([sum_acc[...], sq_acc[...]], axis=0)

    conv_bf16, stats = pl.pallas_call(
        conv_stats_kernel,
        grid=grid,
        in_specs=[
            # Body rows [h*TH, (h+1)*TH) of the padded image n.
            pl.BlockSpec((None, TH, Wp2, Cin), lambda n, h: (n, h, 0, 0)),
            # 2-row halo [(h+1)*TH, (h+1)*TH + 2): block size 2, TH even.
            pl.BlockSpec((None, 2, Wp2, Cin),
                         lambda n, h: (n, (h + 1) * (TH // 2), 0, 0)),
            # Full weight, grid-invariant -> stays resident in VMEM.
            pl.BlockSpec((KH * KW, Cin, Cout), lambda n, h: (0, 0, 0)),
        ],
        out_specs=[
            pl.BlockSpec((None, TH * W, Cout), lambda n, h: (n, h, 0)),
            pl.BlockSpec((2, Cout), lambda n, h: (0, 0)),   # stats (resident)
        ],
        out_shape=[
            jax.ShapeDtypeStruct((N, Hp * W, Cout), jnp.bfloat16),
            jax.ShapeDtypeStruct((2, Cout), jnp.float32),
        ],
        scratch_shapes=[
            pltpu.VMEM((1, Cout), jnp.float32),   # running sum
            pltpu.VMEM((1, Cout), jnp.float32),   # running sum of squares
        ],
        compiler_params=pltpu.CompilerParams(
            dimension_semantics=("arbitrary", "arbitrary"),
            vmem_limit_bytes=VMEM_LIMIT,
        ),
    )(xp, xp, w_mat)

    # ---- hoisted BN affine (tiny per-channel math, done once) ----
    M = N * H * W
    mean = stats[0] / M
    var = jnp.maximum(stats[1] / M - mean * mean, 0.0)
    inv_std = lax.rsqrt(var + BN_EPS)
    scale = gamma.astype(jnp.float32) * inv_std            # (Cout,)
    shift = beta.astype(jnp.float32) - mean * scale        # (Cout,)

    # ---- epilogue: affine + ReLU + unpad + NHWC -> NCHW, left to XLA on
    # purpose (it fuses into one elementwise/transpose pass; a second Pallas
    # kernel would add an extra HBM round trip of the intermediate). ----
    conv = conv_bf16.reshape(N, Hp, W, Cout)[:, :H, :, :].astype(jnp.float32)
    y = jnp.maximum(conv * scale + shift, 0.0)
    return jnp.transpose(y, (0, 3, 1, 2))


def reference(x_nchw, weight_oihw, gamma, beta, conv_round=None):
    """Pure-JAX reference matching PyTorch ConvBnRelu.forward (training BN).

    conv_round: optionally round the conv output to this dtype before the
    affine (emulates the kernel's bf16 intermediate; stats stay f32-exact).
    """
    conv = lax.conv_general_dilated(
        x_nchw, weight_oihw,
        window_strides=(1, 1), padding=((1, 1), (1, 1)),
        dimension_numbers=("NCHW", "OIHW", "NCHW"),
        precision=lax.Precision.HIGHEST)
    mean = jnp.mean(conv, axis=(0, 2, 3), keepdims=True)
    var = jnp.mean((conv - mean) ** 2, axis=(0, 2, 3), keepdims=True)
    if conv_round is not None:
        conv = conv.astype(conv_round).astype(jnp.float32)
    y = (conv - mean) * lax.rsqrt(var + BN_EPS)
    y = y * gamma.reshape(1, -1, 1, 1) + beta.reshape(1, -1, 1, 1)
    return jnp.maximum(y, 0.0)


if __name__ == "__main__":
    N, Cin, H, W = 2, 4, 16, 16
    Cout, KH, KW = 8, 3, 3

    key = jax.random.PRNGKey(0)
    kx, kw = jax.random.split(key)
    x = jax.random.normal(kx, (N, Cin, H, W), dtype=jnp.float32)

    # Deterministic xavier_uniform_ init for the conv weight (Cout, Cin, KH, KW).
    fan_in = Cin * KH * KW
    fan_out = Cout * KH * KW
    bound = math.sqrt(6.0 / (fan_in + fan_out))
    weight = jax.random.uniform(
        kw, (Cout, Cin, KH, KW), minval=-bound, maxval=bound, dtype=jnp.float32)

    # BatchNorm params: weight filled with 1, bias zeroed (as in __init__).
    gamma = jnp.ones((Cout,), dtype=jnp.float32)
    beta = jnp.zeros((Cout,), dtype=jnp.float32)

    out = jax.block_until_ready(conv_bn_relu(x, weight, gamma, beta))
    assert out.shape == (N, Cout, H, W)

    # The kernel feeds the MXU bf16 operands (f32 accumulate) and stores a bf16
    # conv intermediate (stats from the f32 accumulator), so:
    #  (1) tighter check vs a reference emulating those numerics (bf16 operands,
    #      f32 stats, bf16-rounded conv before the affine); tolerances leave
    #      room for one bf16 ULP of rounding-boundary straddle, and
    #  (2) loose check vs the full-f32 reference (total bf16 rounding budget).
    to_bf16 = lambda a: a.astype(jnp.bfloat16).astype(jnp.float32)
    ref_emu = jax.block_until_ready(
        reference(to_bf16(x), to_bf16(weight), gamma, beta, conv_round=jnp.bfloat16))
    ref_f32 = jax.block_until_ready(reference(x, weight, gamma, beta))
    assert jnp.allclose(out, ref_emu, atol=1e-2, rtol=2e-2), \
        "mismatch vs bf16-emulated reference"
    assert jnp.allclose(out, ref_f32, atol=5e-2, rtol=5e-2), \
        "mismatch vs f32 reference"

    print("KERNEL_OK")
</pallas_src>

<mosaic_0001>
module attributes {stable_mosaic.version = 11 : i64} {
  func.func @conv_stats_kernel(%arg0: i32, %arg1: i32, %arg2: memref<1x8x18x4xbf16, #tpu.memory_space<vmem>>, %arg3: memref<1x2x18x4xbf16, #tpu.memory_space<vmem>>, %arg4: memref<9x4x8xbf16, #tpu.memory_space<vmem>>, %arg5: memref<1x128x8xbf16, #tpu.memory_space<vmem>>, %arg6: memref<2x8xf32, #tpu.memory_space<vmem>>, %arg7: memref<1x8xf32, #tpu.memory_space<vmem>>, %arg8: memref<1x8xf32, #tpu.memory_space<vmem>>) attributes {dimension_semantics = [#tpu.dimension_semantics<arbitrary>, #tpu.dimension_semantics<arbitrary>], iteration_bounds = array<i64: 2, 2>, scalar_prefetch = 0 : i64, scratch_operands = 2 : i64, tpu.core_type = #tpu.core_type<tc>, window_params = [{transform_indices = @transform_0, window_bounds = array<i64: 1, 8, 18, 4>}, {transform_indices = @transform_1, window_bounds = array<i64: 1, 2, 18, 4>}, {pipeline_mode = #tpu.pipeline_mode<synchronous>, transform_indices = @transform_2, window_bounds = array<i64: 9, 4, 8>}, {transform_indices = @transform_3, window_bounds = array<i64: 1, 128, 8>}, {pipeline_mode = #tpu.pipeline_mode<synchronous>, transform_indices = @transform_4, window_bounds = array<i64: 2, 8>}]} {
    %c0_i32 = arith.constant 0 : i32
    %0 = arith.cmpi eq, %arg0, %c0_i32 : i32
    %c0_i32_0 = arith.constant 0 : i32
    %1 = arith.cmpi eq, %arg1, %c0_i32_0 : i32
    %2 = arith.andi %0, %1 : i1
    %3 = arith.extui %2 : i1 to i32
    %c0_i32_1 = arith.constant 0 : i32
    %4 = arith.cmpi ne, %3, %c0_i32_1 : i32
    scf.if %4 {
      %cst_52 = arith.constant 0.000000e+00 : f32
      %85 = vector.broadcast %cst_52 : f32 to vector<1x8xf32>
      %c0_53 = arith.constant 0 : index
      %c0_54 = arith.constant 0 : index
      %86 = vector.load %arg7[%c0_53, %c0_54] : memref<1x8xf32, #tpu.memory_space<vmem>>, vector<1x8xf32>
      tpu.vector_store %arg7[%c0_53, %c0_54], %85 {strides = array<i32>} : memref<1x8xf32, #tpu.memory_space<vmem>>, vector<1x8xf32>,
      %cst_55 = arith.constant 0.000000e+00 : f32
      %87 = vector.broadcast %cst_55 : f32 to vector<1x8xf32>
      %c0_56 = arith.constant 0 : index
      %c0_57 = arith.constant 0 : index
      %88 = vector.load %arg8[%c0_56, %c0_57] : memref<1x8xf32, #tpu.memory_space<vmem>>, vector<1x8xf32>
      tpu.vector_store %arg8[%c0_56, %c0_57], %87 {strides = array<i32>} : memref<1x8xf32, #tpu.memory_space<vmem>>, vector<1x8xf32>,
    } else {
    }
    %c0 = arith.constant 0 : index
    %c0_2 = arith.constant 0 : index
    %c0_3 = arith.constant 0 : index
    %c0_4 = arith.constant 0 : index
    %5 = vector.load %arg2[%c0, %c0_2, %c0_3, %c0_4] : memref<1x8x18x4xbf16, #tpu.memory_space<vmem>>, vector<1x8x18x4xbf16>
    %6 = vector.shape_cast %5 : vector<1x8x18x4xbf16> to vector<8x18x4xbf16>
    %c0_5 = arith.constant 0 : index
    %c0_6 = arith.constant 0 : index
    %c0_7 = arith.constant 0 : index
    %c0_8 = arith.constant 0 : index
    %7 = vector.load %arg3[%c0_5, %c0_6, %c0_7, %c0_8] : memref<1x2x18x4xbf16, #tpu.memory_space<vmem>>, vector<1x2x18x4xbf16>
    %8 = vector.shape_cast %7 : vector<1x2x18x4xbf16> to vector<2x18x4xbf16>
    %9 = tpu.concatenate %6, %8 in 0 : vector<8x18x4xbf16>, vector<2x18x4xbf16> -> vector<10x18x4xbf16>
    %cst = arith.constant 0.000000e+00 : f32
    %10 = vector.broadcast %cst : f32 to vector<128x8xf32>
    %11 = vector.extract_strided_slice %9 {offsets = [0, 0, 0], sizes = [8, 16, 4], strides = [1, 1, 1]} : vector<10x18x4xbf16> to vector<8x16x4xbf16>
    %12 = vector.shape_cast %11 : vector<8x16x4xbf16> to vector<128x4xbf16>
    %c0_9 = arith.constant 0 : index
    %c0_10 = arith.constant 0 : index
    %c0_11 = arith.constant 0 : index
    %13 = vector.load %arg4[%c0_9, %c0_10, %c0_11] : memref<9x4x8xbf16, #tpu.memory_space<vmem>>, vector<1x4x8xbf16>
    %14 = vector.shape_cast %13 : vector<1x4x8xbf16> to vector<4x8xbf16>
    %cst_12 = arith.constant dense<0.000000e+00> : vector<128x8xf32>
    %15 = tpu.matmul %12, %14, %cst_12 {dimension_numbers = #tpu.dot_dimension_numbers<[1], [0], [0], [1], [0, 0, 1, 1], [], []>} : vector<128x4xbf16>, vector<4x8xbf16>, vector<128x8xf32> -> vector<128x8xf32>
    %16 = arith.addf %10, %15 : vector<128x8xf32>
    %17 = vector.extract_strided_slice %9 {offsets = [0, 1, 0], sizes = [8, 16, 4], strides = [1, 1, 1]} : vector<10x18x4xbf16> to vector<8x16x4xbf16>
    %18 = vector.shape_cast %17 : vector<8x16x4xbf16> to vector<128x4xbf16>
    %c1 = arith.constant 1 : index
    %c0_13 = arith.constant 0 : index
    %c0_14 = arith.constant 0 : index
    %19 = vector.load %arg4[%c1, %c0_13, %c0_14] : memref<9x4x8xbf16, #tpu.memory_space<vmem>>, vector<1x4x8xbf16>
    %20 = vector.shape_cast %19 : vector<1x4x8xbf16> to vector<4x8xbf16>
    %cst_15 = arith.constant dense<0.000000e+00> : vector<128x8xf32>
    %21 = tpu.matmul %18, %20, %cst_15 {dimension_numbers = #tpu.dot_dimension_numbers<[1], [0], [0], [1], [0, 0, 1, 1], [], []>} : vector<128x4xbf16>, vector<4x8xbf16>, vector<128x8xf32> -> vector<128x8xf32>
    %22 = arith.addf %16, %21 : vector<128x8xf32>
    %23 = vector.extract_strided_slice %9 {offsets = [0, 2, 0], sizes = [8, 16, 4], strides = [1, 1, 1]} : vector<10x18x4xbf16> to vector<8x16x4xbf16>
    %24 = vector.shape_cast %23 : vector<8x16x4xbf16> to vector<128x4xbf16>
    %c2 = arith.constant 2 : index
    %c0_16 = arith.constant 0 : index
    %c0_17 = arith.constant 0 : index
    %25 = vector.load %arg4[%c2, %c0_16, %c0_17] : memref<9x4x8xbf16, #tpu.memory_space<vmem>>, vector<1x4x8xbf16>
    %26 = vector.shape_cast %25 : vector<1x4x8xbf16> to vector<4x8xbf16>
    %cst_18 = arith.constant dense<0.000000e+00> : vector<128x8xf32>
    %27 = tpu.matmul %24, %26, %cst_18 {dimension_numbers = #tpu.dot_dimension_numbers<[1], [0], [0], [1], [0, 0, 1, 1], [], []>} : vector<128x4xbf16>, vector<4x8xbf16>, vector<128x8xf32> -> vector<128x8xf32>
    %28 = arith.addf %22, %27 : vector<128x8xf32>
    %29 = vector.extract_strided_slice %9 {offsets = [1, 0, 0], sizes = [8, 16, 4], strides = [1, 1, 1]} : vector<10x18x4xbf16> to vector<8x16x4xbf16>
    %30 = vector.shape_cast %29 : vector<8x16x4xbf16> to vector<128x4xbf16>
    %c3 = arith.constant 3 : index
    %c0_19 = arith.constant 0 : index
    %c0_20 = arith.constant 0 : index
    %31 = vector.load %arg4[%c3, %c0_19, %c0_20] : memref<9x4x8xbf16, #tpu.memory_space<vmem>>, vector<1x4x8xbf16>
    %32 = vector.shape_cast %31 : vector<1x4x8xbf16> to vector<4x8xbf16>
    %cst_21 = arith.constant dense<0.000000e+00> : vector<128x8xf32>
    %33 = tpu.matmul %30, %32, %cst_21 {dimension_numbers = #tpu.dot_dimension_numbers<[1], [0], [0], [1], [0, 0, 1, 1], [], []>} : vector<128x4xbf16>, vector<4x8xbf16>, vector<128x8xf32> -> vector<128x8xf32>
    %34 = arith.addf %28, %33 : vector<128x8xf32>
    %35 = vector.extract_strided_slice %9 {offsets = [1, 1, 0], sizes = [8, 16, 4], strides = [1, 1, 1]} : vector<10x18x4xbf16> to vector<8x16x4xbf16>
    %36 = vector.shape_cast %35 : vector<8x16x4xbf16> to vector<128x4xbf16>
    %c4 = arith.constant 4 : index
    %c0_22 = arith.constant 0 : index
    %c0_23 = arith.constant 0 : index
    %37 = vector.load %arg4[%c4, %c0_22, %c0_23] : memref<9x4x8xbf16, #tpu.memory_space<vmem>>, vector<1x4x8xbf16>
    %38 = vector.shape_cast %37 : vector<1x4x8xbf16> to vector<4x8xbf16>
    %cst_24 = arith.constant dense<0.000000e+00> : vector<128x8xf32>
    %39 = tpu.matmul %36, %38, %cst_24 {dimension_numbers = #tpu.dot_dimension_numbers<[1], [0], [0], [1], [0, 0, 1, 1], [], []>} : vector<128x4xbf16>, vector<4x8xbf16>, vector<128x8xf32> -> vector<128x8xf32>
    %40 = arith.addf %34, %39 : vector<128x8xf32>
    %41 = vector.extract_strided_slice %9 {offsets = [1, 2, 0], sizes = [8, 16, 4], strides = [1, 1, 1]} : vector<10x18x4xbf16> to vector<8x16x4xbf16>
    %42 = vector.shape_cast %41 : vector<8x16x4xbf16> to vector<128x4xbf16>
    %c5 = arith.constant 5 : index
    %c0_25 = arith.constant 0 : index
    %c0_26 = arith.constant 0 : index
    %43 = vector.load %arg4[%c5, %c0_25, %c0_26] : memref<9x4x8xbf16, #tpu.memory_space<vmem>>, vector<1x4x8xbf16>
    %44 = vector.shape_cast %43 : vector<1x4x8xbf16> to vector<4x8xbf16>
    %cst_27 = arith.constant dense<0.000000e+00> : vector<128x8xf32>
    %45 = tpu.matmul %42, %44, %cst_27 {dimension_numbers = #tpu.dot_dimension_numbers<[1], [0], [0], [1], [0, 0, 1, 1], [], []>} : vector<128x4xbf16>, vector<4x8xbf16>, vector<128x8xf32> -> vector<128x8xf32>
    %46 = arith.addf %40, %45 : vector<128x8xf32>
    %47 = vector.extract_strided_slice %9 {offsets = [2, 0, 0], sizes = [8, 16, 4], strides = [1, 1, 1]} : vector<10x18x4xbf16> to vector<8x16x4xbf16>
    %48 = vector.shape_cast %47 : vector<8x16x4xbf16> to vector<128x4xbf16>
    %c6 = arith.constant 6 : index
    %c0_28 = arith.constant 0 : index
    %c0_29 = arith.constant 0 : index
    %49 = vector.load %arg4[%c6, %c0_28, %c0_29] : memref<9x4x8xbf16, #tpu.memory_space<vmem>>, vector<1x4x8xbf16>
    %50 = vector.shape_cast %49 : vector<1x4x8xbf16> to vector<4x8xbf16>
    %cst_30 = arith.constant dense<0.000000e+00> : vector<128x8xf32>
    %51 = tpu.matmul %48, %50, %cst_30 {dimension_numbers = #tpu.dot_dimension_numbers<[1], [0], [0], [1], [0, 0, 1, 1], [], []>} : vector<128x4xbf16>, vector<4x8xbf16>, vector<128x8xf32> -> vector<128x8xf32>
    %52 = arith.addf %46, %51 : vector<128x8xf32>
    %53 = vector.extract_strided_slice %9 {offsets = [2, 1, 0], sizes = [8, 16, 4], strides = [1, 1, 1]} : vector<10x18x4xbf16> to vector<8x16x4xbf16>
    %54 = vector.shape_cast %53 : vector<8x16x4xbf16> to vector<128x4xbf16>
    %c7 = arith.constant 7 : index
    %c0_31 = arith.constant 0 : index
    %c0_32 = arith.constant 0 : index
    %55 = vector.load %arg4[%c7, %c0_31, %c0_32] : memref<9x4x8xbf16, #tpu.memory_space<vmem>>, vector<1x4x8xbf16>
    %56 = vector.shape_cast %55 : vector<1x4x8xbf16> to vector<4x8xbf16>
    %cst_33 = arith.constant dense<0.000000e+00> : vector<128x8xf32>
    %57 = tpu.matmul %54, %56, %cst_33 {dimension_numbers = #tpu.dot_dimension_numbers<[1], [0], [0], [1], [0, 0, 1, 1], [], []>} : vector<128x4xbf16>, vector<4x8xbf16>, vector<128x8xf32> -> vector<128x8xf32>
    %58 = arith.addf %52, %57 : vector<128x8xf32>
    %59 = vector.extract_strided_slice %9 {offsets = [2, 2, 0], sizes = [8, 16, 4], strides = [1, 1, 1]} : vector<10x18x4xbf16> to vector<8x16x4xbf16>
    %60 = vector.shape_cast %59 : vector<8x16x4xbf16> to vector<128x4xbf16>
    %c8 = arith.constant 8 : index
    %c0_34 = arith.constant 0 : index
    %c0_35 = arith.constant 0 : index
    %61 = vector.load %arg4[%c8, %c0_34, %c0_35] : memref<9x4x8xbf16, #tpu.memory_space<vmem>>, vector<1x4x8xbf16>
    %62 = vector.shape_cast %61 : vector<1x4x8xbf16> to vector<4x8xbf16>
    %cst_36 = arith.constant dense<0.000000e+00> : vector<128x8xf32>
    %63 = tpu.matmul %60, %62, %cst_36 {dimension_numbers = #tpu.dot_dimension_numbers<[1], [0], [0], [1], [0, 0, 1, 1], [], []>} : vector<128x4xbf16>, vector<4x8xbf16>, vector<128x8xf32> -> vector<128x8xf32>
    %64 = arith.addf %58, %63 : vector<128x8xf32>
    %65 = arith.truncf %64 : vector<128x8xf32> to vector<128x8xbf16>
    %c0_37 = arith.constant 0 : index
    %c0_38 = arith.constant 0 : index
    %c0_39 = arith.constant 0 : index
    %66 = vector.load %arg5[%c0_37, %c0_38, %c0_39] : memref<1x128x8xbf16, #tpu.memory_space<vmem>>, vector<1x128x8xbf16>
    %67 = vector.shape_cast %66 : vector<1x128x8xbf16> to vector<128x8xbf16>
    %68 = vector.shape_cast %65 : vector<128x8xbf16> to vector<1x128x8xbf16>
    tpu.vector_store %arg5[%c0_37, %c0_38, %c0_39], %68 {strides = array<i32>} : memref<1x128x8xbf16, #tpu.memory_space<vmem>>, vector<1x128x8xbf16>,
    %c0_40 = arith.constant 0 : index
    %c0_41 = arith.constant 0 : index
    %69 = vector.load %arg7[%c0_40, %c0_41] : memref<1x8xf32, #tpu.memory_space<vmem>>, vector<1x8xf32>
    %cst_42 = arith.constant dense<0.000000e+00> : vector<8xf32>
    %70 = vector.multi_reduction <add>, %64, %cst_42 [0] : vector<128x8xf32> to vector<8xf32>
    %71 = vector.shape_cast %70 : vector<8xf32> to vector<1x8xf32>
    %72 = arith.addf %69, %71 : vector<1x8xf32>
    %c0_43 = arith.constant 0 : index
    %c0_44 = arith.constant 0 : index
    %73 = vector.load %arg7[%c0_43, %c0_44] : memref<1x8xf32, #tpu.memory_space<vmem>>, vector<1x8xf32>
    tpu.vector_store %arg7[%c0_43, %c0_44], %72 {strides = array<i32>} : memref<1x8xf32, #tpu.memory_space<vmem>>, vector<1x8xf32>,
    %c0_45 = arith.constant 0 : index
    %c0_46 = arith.constant 0 : index
    %74 = vector.load %arg8[%c0_45, %c0_46] : memref<1x8xf32, #tpu.memory_space<vmem>>, vector<1x8xf32>
    %75 = arith.mulf %64, %64 : vector<128x8xf32>
    %cst_47 = arith.constant dense<0.000000e+00> : vector<8xf32>
    %76 = vector.multi_reduction <add>, %75, %cst_47 [0] : vector<128x8xf32> to vector<8xf32>
    %77 = vector.shape_cast %76 : vector<8xf32> to vector<1x8xf32>
    %78 = arith.addf %74, %77 : vector<1x8xf32>
    %c0_48 = arith.constant 0 : index
    %c0_49 = arith.constant 0 : index
    %79 = vector.load %arg8[%c0_48, %c0_49] : memref<1x8xf32, #tpu.memory_space<vmem>>, vector<1x8xf32>
    tpu.vector_store %arg8[%c0_48, %c0_49], %78 {strides = array<i32>} : memref<1x8xf32, #tpu.memory_space<vmem>>, vector<1x8xf32>,
    %c1_i32 = arith.constant 1 : i32
    %80 = arith.cmpi eq, %arg0, %c1_i32 : i32
    %c1_i32_50 = arith.constant 1 : i32
    %81 = arith.cmpi eq, %arg1, %c1_i32_50 : i32
    %82 = arith.andi %80, %81 : i1
    %83 = arith.extui %82 : i1 to i32
    %c0_i32_51 = arith.constant 0 : i32
    %84 = arith.cmpi ne, %83, %c0_i32_51 : i32
    scf.if %84 {
      %c0_52 = arith.constant 0 : index
      %c0_53 = arith.constant 0 : index
      %85 = vector.load %arg7[%c0_52, %c0_53] : memref<1x8xf32, #tpu.memory_space<vmem>>, vector<1x8xf32>
      %c0_54 = arith.constant 0 : index
      %c0_55 = arith.constant 0 : index
      %86 = vector.load %arg8[%c0_54, %c0_55] : memref<1x8xf32, #tpu.memory_space<vmem>>, vector<1x8xf32>
      %87 = tpu.concatenate %85, %86 in 0 : vector<1x8xf32>, vector<1x8xf32> -> vector<2x8xf32>
      %c0_56 = arith.constant 0 : index
      %c0_57 = arith.constant 0 : index
      %88 = vector.load %arg6[%c0_56, %c0_57] : memref<2x8xf32, #tpu.memory_space<vmem>>, vector<2x8xf32>
      tpu.vector_store %arg6[%c0_56, %c0_57], %87 {strides = array<i32>} : memref<2x8xf32, #tpu.memory_space<vmem>>, vector<2x8xf32>,
    } else {
    }
    return
  }
  func.func @transform_0(%arg0: i32, %arg1: i32) -> (i32, i32, i32, i32) {
    %c0_i32 = arith.constant 0 : i32
    %c0_i32_0 = arith.constant 0 : i32
    %c0_i32_1 = arith.constant 0 : i32
    return %arg0, %arg1, %c0_i32, %c0_i32_0 : i32, i32, i32, i32
  }
  func.func @transform_1(%arg0: i32, %arg1: i32) -> (i32, i32, i32, i32) {
    %c1_i32 = arith.constant 1 : i32
    %0 = arith.addi %arg1, %c1_i32 : i32
    %c4_i32 = arith.constant 4 : i32
    %1 = arith.muli %0, %c4_i32 : i32
    %c0_i32 = arith.constant 0 : i32
    %c0_i32_0 = arith.constant 0 : i32
    %c0_i32_1 = arith.constant 0 : i32
    return %arg0, %1, %c0_i32, %c0_i32_0 : i32, i32, i32, i32
  }
  func.func @transform_2(%arg0: i32, %arg1: i32) -> (i32, i32, i32) {
    %c0_i32 = arith.constant 0 : i32
    %c0_i32_0 = arith.constant 0 : i32
    %c0_i32_1 = arith.constant 0 : i32
    %c0_i32_2 = arith.constant 0 : i32
    return %c0_i32, %c0_i32_0, %c0_i32_1 : i32, i32, i32
  }
  func.func @transform_3(%arg0: i32, %arg1: i32) -> (i32, i32, i32) {
    %c0_i32 = arith.constant 0 : i32
    %c0_i32_0 = arith.constant 0 : i32
    return %arg0, %arg1, %c0_i32 : i32, i32, i32
  }
  func.func @transform_4(%arg0: i32, %arg1: i32) -> (i32, i32) {
    %c0_i32 = arith.constant 0 : i32
    %c0_i32_0 = arith.constant 0 : i32
    %c0_i32_1 = arith.constant 0 : i32
    return %c0_i32, %c0_i32_0 : i32, i32
  }
}

</mosaic_0001>

<bundles_post_ra>
// kernel: conv_bn_relu.1
= control target key start
LH: loop header
LB: loop body
LE: loop exit
PB: predicated region body
PF: predicated region fallthrough
CT: control target
= control target key end

     0   :  { %s2912_s15 = smov 0   ;;  %s2914_s16 = smov 0   ;;  %s3582_s0 = inlined_call_operand.vmem [shape: bf16[2,18,18,4], index: 0, kind: input, shape index: {}, may-alias: {0,1}]   ;;  %s3583_s1 = inlined_call_operand.vmem [shape: bf16[2,18,18,4], index: 1, kind: input, shape index: {}, may-alias: {0,1}]   ;;  %s3584_s2 = inlined_call_operand.vmem [shape: bf16[9,4,8], index: 2, kind: input, shape index: {}]   ;;  %s3585_s3 = inlined_call_operand.vmem [shape: bf16[2,256,8], index: 3, kind: output, shape index: {0}]   ;;  %s3586_s4 = inlined_call_operand.vmem [shape: f32[2,8], index: 4, kind: output, shape index: {1}]  }
   0x1   :  { %s2916_s17 = smov 0   ;;  %s2918_s18 = smov 0  }
   0x2   :  { %s2920_s19 = smov 0  }
   0x3 LB: > { %s24_s20 = sadd.s32 1, %s2876_s17  ;;  %s27_s21 = sadd.s32 1, %s2880_s18  ;;  %s2884_s19 = sphi %s2920_s19, %s15_s19   ;;  %s2880_s18 = sphi %s2918_s18, %s3595_s18   ;;  %s2876_s17 = sphi %s2916_s17, %s3594_s17   ;;  %s2872_s16 = sphi %s2914_s16, %s3593_s16   ;;  %s2868_s15 = sphi %s2912_s15, %s3592_s15  }
   0x4   : > { %p25_p0 = scmp.ge.s32.totalorder %s24_s20, 2  ;;  %p2236_p1 = scmp.ge.s32.totalorder %s2884_s19, 1 }
   0x5   : > { %p218_p2 = scmp.lt.s32.totalorder %s2884_s19, 5 }
   0x6   : > { %s3597_s20 = smov (%p25_p0, %s24_s20), 0  ;;  %s3599_s21 = smov (!%p25_p0, %s27_s21), %s2880_s18 }
   0x7   : > { %p219_p3 = pnand %p2236_p1, %p218_p2  ;;  %p29_p4 = scmp.ge.s32.totalorder %s3599_s21, 2 }
   0x8   : > { %s2237_s22 = sshll.u32 (!%p219_p3), %s2868_s15, 3  ;;  %p276_p5 = scmp.lt.s32.totalorder (!%p219_p3), %s2872_s16, 1 }
   0x9   : > { %s3601_s21 = smov (%p29_p4, %s3599_s21), 0  ;;  %222 = sbr.rel (%p219_p3) target bundleno = 446 (0x1be), region = 32 }
   0xa   : > { %p278_p6 = scmp.lt.s32.totalorder (!%p219_p3), %s2237_s22, 17  ;;  %s2408_s23 = sadd.s32 (!%p219_p3), 8, %s2237_s22 }
   0xb   : > { %p296_p7 = scmp.lt.s32.totalorder (!%p219_p3), %s2408_s23, 17  ;;  %s2242_s27 = sshll.u32 (!%p219_p3), %s2868_s15, 4 }
   0xc   : > { %p309_p8 = scmp.lt.s32.totalorder (!%p219_p3), %s2242_s27, 31  ;;  %p317_p9 = scmp.eq.s32.totalorder (!%p219_p3), %s2872_s16, 0 }
   0xd   : > { %p318_p10 = scmp.eq.s32.totalorder (!%p219_p3), %s2868_s15, 0 }
   0xf   : > { %p319_p11 = pnand (!%p219_p3), %p318_p10, %p317_p9 }
  0x10   : > { %s277_s24 = scalar_select %p276_p5, %s2872_s16, 1 }
  0x11   : > { %s3603_s22 = smov (!%p278_p6, %s2237_s22), 17  ;;  %s3605_s23 = smov (!%p296_p7, %s2408_s23), 17 }
  0x12   : > { %s2793_s25 = smul.u32 54, %s277_s24  ;;  %s2243_s13 = sshll.u32 %s277_s24, 5  ;;  %vm323_vm0 = vcmask (!%p319_p11), 57344   ;;  %v2886_v0 = vmov (!%p319_p11), 0.0  }
  0x13   : > { %s2792_s26 = smul.u32 3, %s3603_s22  ;;  %s3607_s27 = smov (!%p309_p8, %s2242_s27), 31  ;;  %324 = vst.msk [vmem:[#allocation2] sm:$0x1] (!%p319_p11), %vm323_vm0, %v2886_v0  ;;  %325 = vst.msk [vmem:[#allocation3] sm:$0x1] (!%p319_p11), %vm323_vm0, %v2886_v0 }
  0x14   : > { %s2794_s30 = smul.u32 3, %s3605_s23  ;;  %s312_s14 = sadd.s32 %s2243_s13, %s3607_s27 }
  0x15   : > { %s282_s28 = sadd.s32 %s2793_s25, %s2792_s26  ;;  %s2244_s22 = sshll.u32 %s312_s14, 2 }
  0x16   : > { %s2238_s29 = sshll.u32 %s282_s28, 2  ;;  %s300_s8 = sadd.s32 %s2794_s30, %s2793_s25 }
  0x17   : > { %s2953_s7 = scalar_lea.vmem %s3582_s0, %s2238_s29  ;;  %s2241_s9 = sshll.u32 %s300_s8, 2 }
  0x18   : > { %s2960_s12 = scalar_lea.vmem %s3583_s1, %s2241_s9  ;;  %s2965_s28 = scalar_lea.vmem %s3585_s3, %s2244_s22 }
  0x19   : > { %322 = sbr.rel (%p319_p11) target bundleno = 32 (0x20), region = 36 }
  0x20 PF: > { %v2245_v1 = vld [vmem:[%s3584_s2 + $0x2] sm:$0x3]  ;;  %vm603_vm1 = vcmask 1041408   ;;  %v2973_v2 = vld [vmem:[%s3584_s2 + $0x8] sm:$0x3]  ;;  %vm578_vm5 = vcmask 31744  }
  0x21   : > { %2782 = vmatprep.subr.msk.bf16.mxu1 %vm603_vm1, %v2245_v1  ;;  %2786 = vmatprep.subr.msk.bf16.mxu0 %vm603_vm1, %v2973_v2  ;;  %v605_v3 = vsel %vm603_vm1, %v2245_v1, 0  ;;  %v2981_v4 = vsel %vm603_vm1, %v2973_v2, 0  ;;  %v2984_v5 = vld [vmem:[%s2953_s7] sm:$0xf]  ;;  %v2987_v6 = vld [vmem:[%s2953_s7 + $0x4] sm:$0xf] }
  0x22   : > { %2491 = vmatpush3.bf16.msra.mxu1 %v605_v3  ;;  %2563 = vmatpush3.bf16.msra.mxu0 %v2981_v4  ;;  %v2991_v7 = vld [vmem:[%s2953_s7 + $0x8] sm:$0x1]  ;;  %vm357_vm2 = vsmask.f32 3328  ;;  %vm358_vm3 = vsmask.f32 7440 }
  0x23   : > { %v361_v8 = vshrl.u32 %v2984_v5, 16  ;;  %v364_v9 = vshll.u32 %v2984_v5, 16  ;;  %v370_v10 = vshll.u32 %v2987_v6, 16  ;;  %v374_v11 = vshrl.u32 %v2987_v6, 16  ;;  %v356_v12 = vld [vmem:[%s3584_s2] sm:$0x3]  ;;  %vm3025_vm4 = vmor %vm357_vm2, %vm358_vm3 }
  0x24   : > { %v380_v13 = vshll.u32 %v2991_v7, 16  ;;  %2783 = vmatprep.subr.msk.bf16.mxu1 %vm603_vm1, %v356_v12  ;;  %v3003_v14 = vld [vmem:[%s2953_s7 + $0xc] sm:$0xf]  ;;  %v3006_v15 = vld [vmem:[%s2953_s7 + $0x10] sm:$0xf]  ;;  %v769_v42 = vsel %vm603_vm1, %v356_v12, 0 }
  0x25   : > { %v363_v16 = vrot.slane %v361_v8, 4  ;;  %v366_v17 = vrot.slane %v364_v9, 5  ;;  %v372_v18 = vrot.slane %v370_v10, 5  ;;  %v376_v19 = vrot.slane %v374_v11, 4  ;;  %v3009_v20 = vld [vmem:[%s2953_s7 + $0x14] sm:$0x1] }
  0x26   : > { %v382_v21 = vrot.slane %v380_v13, 5  ;;  %v385_v22 = vshrl.u32 %v3003_v14, 16  ;;  %v388_v23 = vshll.u32 %v3003_v14, 16  ;;  %v394_v24 = vshll.u32 %v3006_v15, 16  ;;  %v2324_v25 = vld [vmem:[%s3584_s2 + $0xa] sm:$0x3] }
  0x27   : > { %v367_v26 = vor.u32 %v366_v17, %v363_v16  ;;  %v377_v27 = vor.u32 %v376_v19, %v372_v18  ;;  %v398_v28 = vshrl.u32 %v3006_v15, 16  ;;  %v404_v29 = vshll.u32 %v3009_v20, 16  ;;  %2788 = vmatprep.subr.msk.bf16.mxu0 %vm603_vm1, %v2324_v25  ;;  %v3021_v30 = vld [vmem:[%s2953_s7 + $0x18] sm:$0xf]  ;;  %v3030_v39 = vld [vmem:[%s2953_s7 + $0x1c] sm:$0xf] }
  0x28   : > { %v387_v32 = vrot.slane %v385_v22, 4  ;;  %v390_v33 = vrot.slane %v388_v23, 5  ;;  %v396_v34 = vrot.slane %v394_v24, 5  ;;  %v891_v41 = vrot.slane %v3009_v20, 5  ;;  %v3035_v43 = vld [vmem:[%s2953_s7 + $0x20] sm:$0x1] }
  0x29   : > { %v368_v35 = vrot.slane %v367_v26, 4  ;;  %v378_v36 = vrot.slane %v377_v27, 4  ;;  %v400_v37 = vrot.slane %v398_v28, 4  ;;  %v406_v38 = vrot.slane %v404_v29, 5  ;;  %v3047_v57 = vld [vmem:[%s2953_s7 + $0x24] sm:$0xf] }
  0x2a   : > { %v391_v40 = vor.u32 %v390_v33, %v387_v32  ;;  %v409_v44 = vshrl.u32 %v3021_v30, 16  ;;  %v412_v48 = vshll.u32 %v3021_v30, 16  ;;  %v418_v52 = vshll.u32 %v3030_v39, 16  ;;  %v3055_v62 = vld [vmem:[%s2953_s7 + $0x28] sm:$0xf]  ;;  %p2092_p12 = scmp.eq.s32.totalorder %s2872_s16, 1 }
  0x2b   : > { %v373_v45 = vsel %vm3025_vm4, %v368_v35, %v372_v18  ;;  %v383_v46 = vsel %vm3025_vm4, %v378_v36, %v382_v21  ;;  %v401_v47 = vor.u32 %v400_v37, %v396_v34  ;;  %v422_v55 = vshrl.u32 %v3030_v39, 16  ;;  %v3060_v8 = vld [vmem:[%s2953_s7 + $0x2c] sm:$0x1]  ;;  %v3063_v9 = vld [vmem:[%s2953_s7 + $0x30] sm:$0xf]  ;;  %p2093_p13 = scmp.eq.s32.totalorder %s2868_s15, 1 }
  0x2c   : > { %v2246_v49 = vcombine.low %v373_v45, %v383_v46  ;;  %v392_v50 = vrot.slane %v391_v40, 4  ;;  %v411_v51 = vrot.slane %v409_v44, 4  ;;  %v414_v54 = vrot.slane %v412_v48, 5  ;;  %v3074_v24 = vld [vmem:[%s2953_s7 + $0x34] sm:$0xf] }
  0x2d   : > { %v402_v53 = vrot.slane %v401_v47, 4  ;;  %v428_v56 = vshll.u32 %v3035_v43, 16  ;;  %v420_v59 = vrot.slane %v418_v52, 5  ;;  %v895_v60 = vrot.slane %v3030_v39, 5  ;;  %v3080_v32 = vld [vmem:[%s2953_s7 + $0x38] sm:$0x1]  ;;  %p3494_p0 = pnand %p2093_p13, %p2092_p12 }
  0x2e   : > { %2492 = vmatprep.mubr.msk.bf16.mxu1 %vm578_vm5, %v2246_v49  ;;  %v397_v58 = vsel %vm3025_vm4, %v392_v50, %v396_v34  ;;  %v898_v61 = vrot.slane %v3035_v43, 5  ;;  %v415_v0 = vor.u32 %v414_v54, %v411_v51  ;;  %v424_v1 = vrot.slane %v422_v55, 4  ;;  %v2334_v44 = vld [vmem:[%s3584_s2 + $0xc] sm:$0x3]  ;;  %v3096_v49 = vld [vmem:[%s3584_s2 + $0x4] sm:$0x3] }
  0x2f   : > { %v407_v63 = vsel %vm3025_vm4, %v402_v53, %v406_v38  ;;  %v430_v3 = vrot.slane %v428_v56, 5  ;;  %v1392_v11 = vsel %vm603_vm1, %v2324_v25, 0  ;;  %v433_v12 = vshrl.u32 %v3047_v57, 16  ;;  %v3099_v53 = vld [vmem:[%s2953_s7 + $0x3c] sm:$0xf] }
  0x30   : > { %v2247_v10 = vcombine.low %v397_v58, %v407_v63  ;;  %v436_v13 = vshll.u32 %v3047_v57, 16  ;;  %v416_v16 = vrot.slane %v415_v0, 4  ;;  %v425_v17 = vor.u32 %v424_v1, %v420_v59  ;;  %v3110_v58 = vld [vmem:[%s2953_s7 + $0x40] sm:$0xf] }
  0x31   : > { %v442_v18 = vshll.u32 %v3055_v62, 16  ;;  %v446_v19 = vshrl.u32 %v3055_v62, 16  ;;  %v435_v21 = vrot.slane %v433_v12, 4  ;;  %v452_v23 = vshll.u32 %v3060_v8, 16 }
  0x32   : > { %2564 = vmatprep.mubr.msk.bf16.mxu0 %vm578_vm5, %v2247_v10  ;;  %2493 = vmatmul.mubr.msk.bf16.vlgmr.msra.gmra.mrb[0].mxu1 %vm578_vm5, %v2247_v10  ;;  %v438_v22 = vrot.slane %v436_v13, 5  ;;  %v457_v25 = vshrl.u32 %v3063_v9, 16  ;;  %v421_v26 = vsel %vm3025_vm4, %v416_v16, %v420_v59  ;;  %v426_v27 = vrot.slane %v425_v17, 4  ;;  %v3124_v13 = vld [vmem:[%s2953_s7 + $0x44] sm:$0x1] }
  0x33   : > { %2509 = vmatpush3.bf16.msra.mxu1 %v769_v42  ;;  %v444_v28 = vrot.slane %v442_v18, 5  ;;  %v448_v29 = vrot.slane %v446_v19, 4  ;;  %v454_v34 = vrot.slane %v452_v23, 5  ;;  %v460_v36 = vshll.u32 %v3063_v9, 16 }
  0x34   : > { %v439_v33 = vor.u32 %v438_v22, %v435_v21  ;;  %v459_v35 = vrot.slane %v457_v25, 4  ;;  %v431_v37 = vsel %vm3025_vm4, %v426_v27, %v430_v3  ;;  %v466_v40 = vshll.u32 %v3074_v24, 16  ;;  %2784 = vmatprep.subr.msk.bf16.mxu1 %vm603_vm1, %v3096_v49 }
  0x35   : > { %v449_v38 = vor.u32 %v448_v29, %v444_v28  ;;  %v470_v42 = vshrl.u32 %v3074_v24, 16  ;;  %v3090_v45 = vcombine.low %v421_v26, %v431_v37  ;;  %v462_v47 = vrot.slane %v460_v36, 5 }
  0x36   : > { %v440_v46 = vrot.slane %v439_v33, 4  ;;  %v476_v48 = vshll.u32 %v3080_v32, 16  ;;  %v468_v51 = vrot.slane %v466_v40, 5  ;;  %vm876_vm6 = vcmask 1042432   ;;  %v3153_v40 = vld [vmem:[%s2953_s7 + $0x4c] sm:$0xf] }
  0x37   : > { %v450_v50 = vrot.slane %v449_v38, 4  ;;  %v472_v52 = vrot.slane %v470_v42, 4  ;;  %2565 = vmatmul.mubr.msk.bf16.vlgmr.msra.gmra.mrb[0].mxu0 %vm578_vm5, %v3090_v45  ;;  %2496 = vmatprep.mubr.msk.bf16.mxu1 %vm578_vm5, %v3090_v45  ;;  %v463_v55 = vor.u32 %v462_v47, %v459_v35  ;;  %vm877_vm7 = vcmask 1046532  }
  0x38   : > { %v445_v54 = vsel %vm3025_vm4, %v440_v46, %v444_v28  ;;  %v478_v56 = vrot.slane %v476_v48, 5  ;;  %2581 = vmatpush3.bf16.msra.mxu0 %v1392_v11  ;;  %vm3114_vm8 = vmor %vm876_vm6, %vm877_vm7  ;;  %v2279_v1 = vrot.slane %v3003_v14, 9  ;;  %v888_v3 = vrot.slane %v3006_v15, 5 }
  0x39   : > { %v455_v59 = vsel %vm3025_vm4, %v450_v50, %v454_v34  ;;  %v473_v63 = vor.u32 %v472_v52, %v468_v51  ;;  %v464_v12 = vrot.slane %v463_v55, 4  ;;  %2789 = vmatprep.subr.msk.bf16.mxu0 %vm603_vm1, %v2334_v44  ;;  %v481_v11 = vshrl.u32 %v3099_v53, 16  ;;  %v3146_v34 = vld [vmem:[%s2953_s7 + $0x48] sm:$0xf]  ;;  %v3164_v50 = vld [vmem:[%s2953_s7 + $0x50] sm:$0x1] }
  0x3a   : > { %v3120_v10 = vcombine.low %v445_v54, %v455_v59  ;;  %v484_v16 = vshll.u32 %v3099_v53, 16  ;;  %v889_v18 = vsel %vm3114_vm8, %v2279_v1, %v888_v3  ;;  %v890_v19 = vrot.slane %v888_v3, 4 }
  0x3b   : > { %v474_v17 = vrot.slane %v473_v63, 4  ;;  %v490_v21 = vshll.u32 %v3110_v58, 16  ;;  %v469_v22 = vsel %vm3025_vm4, %v464_v12, %v468_v51  ;;  %v483_v23 = vrot.slane %v481_v11, 4 }
  0x3c   : > { %2568 = vmatprep.mubr.msk.bf16.mxu0 %vm578_vm5, %v3120_v10  ;;  %2497 = vmatmul.mubr.msk.bf16.gmra.mrb[4].mxu1 %vm578_vm5, %v3120_v10  ;;  %v486_v25 = vrot.slane %v484_v16, 5  ;;  %v494_v26 = vshrl.u32 %v3110_v58, 16  ;;  %v892_v28 = vsel %vm3114_vm8, %v890_v19, %v891_v41  ;;  %v500_v33 = vshll.u32 %v3124_v13, 16  ;;  %v3186_v16 = vld [vmem:[%s2953_s7 + $0x54] sm:$0xf] }
  0x3d   : > { %v479_v27 = vsel %vm3025_vm4, %v474_v17, %v478_v56  ;;  %v492_v29 = vrot.slane %v490_v21, 5  ;;  %v3150_v36 = vcombine.low %v889_v18, %v892_v28  ;;  %v2280_v20 = vrot.slane %v3021_v30, 9  ;;  %v3194_v21 = vld [vmem:[%s2953_s7 + $0x58] sm:$0xf] }
  0x3e   : > { %v3148_v35 = vcombine.low %v469_v22, %v479_v27  ;;  %v487_v37 = vor.u32 %v486_v25, %v483_v23  ;;  %v496_v38 = vrot.slane %v494_v26, 4  ;;  %v502_v42 = vrot.slane %v500_v33, 5  ;;  %v3199_v27 = vld [vmem:[%s2953_s7 + $0x5c] sm:$0x1] }
  0x3f   : > { %v897_v41 = vrot.slane %v895_v60, 4  ;;  %v1518_v46 = vsel %vm603_vm1, %v2334_v44, 0  ;;  %v505_v51 = vshrl.u32 %v3146_v34, 16  ;;  %v508_v52 = vshll.u32 %v3146_v34, 16 }
  0x40   : > { %2569 = vmatmul.mubr.msk.bf16.gmra.mrb[4].mxu0 %vm578_vm5, %v3148_v35  ;;  %2500 = vmatprep.mubr.msk.bf16.mxu1 %vm578_vm5, %v3148_v35  ;;  %v488_v47 = vrot.slane %v487_v37, 4  ;;  %v497_v48 = vor.u32 %v496_v38, %v492_v29  ;;  %v896_v44 = vsel %vm3114_vm8, %v2280_v20, %v895_v60  ;;  %v514_v55 = vshll.u32 %v3153_v40, 16 }
  0x41   : > { %2582 = vmatprep.mubr.msk.bf16.mxu0 %vm578_vm5, %v3150_v36  ;;  %v899_v54 = vsel %vm3114_vm8, %v897_v41, %v898_v61  ;;  %v518_v56 = vshrl.u32 %v3153_v40, 16  ;;  %v507_v3 = vrot.slane %v505_v51, 4  ;;  %v510_v12 = vrot.slane %v508_v52, 5  ;;  %v3212_v41 = vld [vmem:[%s3584_s2 + $0xe] sm:$0x3] }
  0x42   : > { %v493_v59 = vsel %vm3025_vm4, %v488_v47, %v492_v29  ;;  %v498_v63 = vrot.slane %v497_v48, 4  ;;  %v3182_v1 = vcombine.low %v896_v44, %v899_v54  ;;  %v516_v60 = vrot.slane %v514_v55, 5 }
  0x43   : > { %v520_v11 = vrot.slane %v518_v56, 4  ;;  %v524_v43 = vshll.u32 %v3164_v50, 16  ;;  %v2281_v17 = vrot.slane %v3047_v57, 9  ;;  %v902_v18 = vrot.slane %v3055_v62, 5 }
  0x44   : > { %v503_v61 = vsel %vm3025_vm4, %v498_v63, %v502_v42  ;;  %v905_v19 = vrot.slane %v3060_v8, 5  ;;  %v511_v23 = vor.u32 %v510_v12, %v507_v3  ;;  %v529_v33 = vshrl.u32 %v3186_v16, 16 }
  0x45   : > { %v3196_v22 = vcombine.low %v493_v59, %v503_v61  ;;  %v521_v25 = vor.u32 %v520_v11, %v516_v60  ;;  %v526_v26 = vrot.slane %v524_v43, 5  ;;  %v903_v28 = vsel %vm3114_vm8, %v2281_v17, %v902_v18 }
  0x46   : > { %v904_v29 = vrot.slane %v902_v18, 4  ;;  %v532_v37 = vshll.u32 %v3186_v16, 16  ;;  %v512_v8 = vrot.slane %v511_v23, 4  ;;  %v538_v42 = vshll.u32 %v3194_v21, 16 }
  0x47   : > { %2501 = vmatmul.mubr.msk.bf16.gmra.mrb[8].mxu1 %vm578_vm5, %v3196_v22  ;;  %v522_v38 = vrot.slane %v521_v25, 4  ;;  %v542_v20 = vshrl.u32 %v3194_v21, 16  ;;  %v531_v48 = vrot.slane %v529_v33, 4  ;;  %v548_v52 = vshll.u32 %v3199_v27, 16 }
  0x48   : > { %2583 = vmatmul.mubr.msk.bf16.vlgmr.msra.gmra.mrb[0].mxu0 %vm578_vm5, %v3182_v1  ;;  %v906_v47 = vsel %vm3114_vm8, %v904_v29, %v905_v19  ;;  %v534_v51 = vrot.slane %v532_v37, 5  ;;  %v517_v44 = vsel %vm3025_vm4, %v512_v8, %v516_v60  ;;  %v540_v56 = vrot.slane %v538_v42, 5 }
  0x49   : > { %2599 = vmatpush3.bf16.msra.mxu0 %v1518_v46  ;;  %v527_v54 = vsel %vm3025_vm4, %v522_v38, %v526_v26  ;;  %v3223_v55 = vcombine.low %v903_v28, %v906_v47  ;;  %v544_v3 = vrot.slane %v542_v20, 4  ;;  %v550_v12 = vrot.slane %v548_v52, 5 }
  0x4a   : > { %v3225_v59 = vcombine.low %v517_v44, %v527_v54  ;;  %v535_v63 = vor.u32 %v534_v51, %v531_v48  ;;  %2790 = vmatprep.subr.msk.bf16.mxu0 %vm603_vm1, %v3212_v41  ;;  %v2282_v46 = vrot.slane %v3063_v9, 9  ;;  %v909_v60 = vrot.slane %v3074_v24, 5  ;;  %v3260_v51 = vld [vmem:[%s2960_s12 + $0x4] sm:$0xf] }
  0x4b   : > { %2586 = vmatprep.mubr.msk.bf16.mxu0 %vm578_vm5, %v3223_v55  ;;  %v912_v11 = vrot.slane %v3080_v32, 5  ;;  %v2283_v43 = vrot.slane %v3099_v53, 9  ;;  %v545_v17 = vor.u32 %v544_v3, %v540_v56  ;;  %v916_v18 = vrot.slane %v3110_v58, 5 }
  0x4c   : > { %2504 = vmatprep.mubr.msk.bf16.mxu1 %vm578_vm5, %v3225_v59  ;;  %v536_v61 = vrot.slane %v535_v63, 4  ;;  %v919_v19 = vrot.slane %v3124_v13, 5  ;;  %v910_v23 = vsel %vm3114_vm8, %v2282_v46, %v909_v60  ;;  %v911_v25 = vrot.slane %v909_v60, 4  ;;  %v3283_v60 = vld [vmem:[%s2960_s12] sm:$0xf] }
  0x4d   : > { %v2262_v26 = vcombine.low %v2984_v5, %v2987_v6  ;;  %v546_v28 = vrot.slane %v545_v17, 4  ;;  %v917_v29 = vsel %vm3114_vm8, %v2283_v43, %v916_v18  ;;  %v918_v33 = vrot.slane %v916_v18, 4 }
  0x4e   : > { %v541_v32 = vsel %vm3025_vm4, %v536_v61, %v540_v56  ;;  %v913_v37 = vsel %vm3114_vm8, %v911_v25, %v912_v11  ;;  %v2284_v13 = vrot.slane %v3146_v34, 9  ;;  %v923_v8 = vrot.slane %v3153_v40, 5  ;;  %v3286_v11 = vld [vmem:[%s2960_s12 + $0x8] sm:$0x1] }
  0x4f   : > { %v926_v38 = vrot.slane %v3164_v50, 5  ;;  %v551_v42 = vsel %vm3025_vm4, %v546_v28, %v550_v12  ;;  %v3254_v20 = vcombine.low %v910_v23, %v913_v37  ;;  %v920_v47 = vsel %vm3114_vm8, %v918_v33, %v919_v19 }
  0x50   : > { %v2285_v48 = vrot.slane %v3186_v16, 9  ;;  %v3262_v52 = vcombine.low %v541_v32, %v551_v42  ;;  %v3264_v44 = vcombine.low %v917_v29, %v920_v47  ;;  %v925_v54 = vrot.slane %v923_v8, 4  ;;  %v2303_v29 = vld [vmem:[%s3584_s2 + $0x6] sm:$0x3] }
  0x51   : > { %2587 = vmatmul.mubr.msk.bf16.gmra.mrb[4].mxu0 %vm578_vm5, %v3254_v20  ;;  %v930_v50 = vrot.slane %v3194_v21, 5  ;;  %v933_v56 = vrot.slane %v3199_v27, 5  ;;  %v924_v63 = vsel %vm3114_vm8, %v2284_v13, %v923_v8  ;;  %v1378_v12 = vrot.slane %v3260_v51, 5 }
  0x52   : > { %2505 = vmatmul.mubr.msk.bf16.gmra.mrb[12].mxu1 %vm578_vm5, %v3262_v52  ;;  %2590 = vmatprep.mubr.msk.bf16.mxu0 %vm578_vm5, %v3264_v44  ;;  %v927_v3 = vsel %vm3114_vm8, %v925_v54, %v926_v38  ;;  %v884_v43 = vrot.slane %v2991_v7, 5  ;;  %v3291_v61 = vcombine.low %v3003_v14, %v3006_v15  ;;  %v2278_v19 = vrot.slane %v2984_v5, 9 }
  0x53   : > { %2510 = vmatprep.mubr.msk.bf16.mxu1 %vm578_vm5, %v2262_v26  ;;  %v931_v46 = vsel %vm3114_vm8, %v2285_v48, %v930_v50  ;;  %v932_v27 = vrot.slane %v930_v50, 4  ;;  %v3293_v17 = vcombine.low %v924_v63, %v927_v3  ;;  %v881_v23 = vrot.slane %v2987_v6, 5 }
  0x54   : > { %v2323_v26 = vrot.slane %v3283_v60, 9  ;;  %v1380_v32 = vrot.slane %v1378_v12, 4  ;;  %v1381_v7 = vrot.slane %v3286_v11, 5  ;;  %v3305_v14 = vcombine.low %v3021_v30, %v3030_v39 }
  0x55   : > { %v934_v18 = vsel %vm3114_vm8, %v932_v27, %v933_v56  ;;  %v882_v15 = vsel %vm3114_vm8, %v2278_v19, %v881_v23  ;;  %v883_v28 = vrot.slane %v881_v23, 4  ;;  %v986_v5 = vsel %vm603_vm1, %v3096_v49, 0  ;;  %v355_v23 = vld [vmem:[%s2960_s12 + $0x14] sm:$0x1] }
  0x56   : > { %v3299_v25 = vcombine.low %v931_v46, %v934_v18  ;;  %v1379_v30 = vsel %vm3114_vm8, %v2323_v26, %v1378_v12  ;;  %v1382_v39 = vsel %vm3114_vm8, %v1380_v32, %v1381_v7  ;;  %v3333_v37 = vcombine.low %v3047_v57, %v3055_v62 }
  0x57   : > { %v885_v6 = vsel %vm3114_vm8, %v883_v28, %v884_v43  ;;  %v3329_v33 = vcombine.low %v1379_v30, %v1382_v39  ;;  %v3337_v13 = vcombine.low %v3063_v9, %v3074_v24  ;;  %v3349_v57 = vcombine.low %v3099_v53, %v3110_v58  ;;  %v2355_v24 = vld [vmem:[%s3584_s2 + $0x10] sm:$0x3] }
  0x58   : > { %v2287_v49 = vcombine.low %v882_v15, %v885_v6  ;;  %v1666_v62 = vsel %vm603_vm1, %v3212_v41, 0  ;;  %v3355_v9 = vcombine.low %v3146_v34, %v3153_v40  ;;  %v3371_v53 = vcombine.low %v3186_v16, %v3194_v21  ;;  %v3392_v40 = vld [vmem:[%s2960_s12 + $0xc] sm:$0xf]  ;;  %v3395_v16 = vld [vmem:[%s2960_s12 + $0x10] sm:$0xf] }
  0x59   : > { %2591 = vmatmul.mubr.msk.bf16.gmra.mrb[8].mxu0 %vm578_vm5, %v3293_v17  ;;  %v3382_v58 = vcombine.low %v3283_v60, %v3260_v51  ;;  %v1112_v34 = vsel %vm603_vm1, %v2303_v29, 0  ;;  %v2335_v21 = vcombine.low %v3392_v40, %v3395_v16  ;;  %v1231_v41 = vshll.u32 %v3283_v60, 16 }
  0x5a   : > { %2511 = vmatmul.mubr.msk.bf16.vlgmr.msra.gmra.mrb[0].mxu1 %vm578_vm5, %v3291_v61  ;;  %2594 = vmatprep.mubr.msk.bf16.mxu0 %vm578_vm5, %v3299_v25  ;;  %v1241_v8 = vshrl.u32 %v3260_v51, 16  ;;  %v1798_v38 = vsel %vm603_vm1, %v2355_v24, 0  ;;  %v1637_v50 = vshll.u32 %v3392_v40, 16  ;;  %v1647_v56 = vshrl.u32 %v3395_v16, 16 }
  0x5b   : > { %2527 = vmatpush3.bf16.msra.mxu1 %v986_v5  ;;  %2514 = vmatprep.mubr.msk.bf16.mxu1 %vm578_vm5, %v3305_v14  ;;  %v1233_v47 = vrot.slane %v1231_v41, 5  ;;  %v1247_v3 = vshll.u32 %v3286_v11, 16  ;;  %v1653_v11 = vshll.u32 %v355_v23, 16  ;;  %v2354_v31 = vrot.slane %v3392_v40, 9 }
  0x5c   : > { %2785 = vmatprep.subr.msk.bf16.mxu1 %vm603_vm1, %v2303_v29  ;;  %v1243_v54 = vrot.slane %v1241_v8, 4  ;;  %v1639_v46 = vrot.slane %v1637_v50, 5  ;;  %vm1977_vm9 = vcmask 60416   ;;  %vm1995_vm10 = vcmask 64512  }
  0x5d   : > { %v1249_v19 = vrot.slane %v1247_v3, 5  ;;  %v1655_v6 = vrot.slane %v1653_v11, 5  ;;  %vm2034_vm11 = vcmask 57344   ;;  %vm2106_vm12 = vcmask (!%p3494_p0), 1040384  }
  0x5e   : > { %vm2108_vm13 = vcmask (!%p3494_p0), 58368  }
  0x61   : > { %2595 = vmatmul.mubr.msk.bf16.gmra.mrb[12].mxu0 %vm578_vm5, %v3329_v33 }
  0x62   : > { %2515 = vmatmul.mubr.msk.bf16.gmra.mrb[4].mxu1 %vm578_vm5, %v3333_v37  ;;  %2600 = vmatprep.mubr.msk.bf16.mxu0 %vm578_vm5, %v3305_v14 }
  0x63   : > { %2518 = vmatprep.mubr.msk.bf16.mxu1 %vm578_vm5, %v3337_v13 }
  0x69   : > { %2601 = vmatmul.mubr.msk.bf16.vlgmr.msra.gmra.mrb[0].mxu0 %vm578_vm5, %v3333_v37 }
  0x6a   : > { %2519 = vmatmul.mubr.msk.bf16.gmra.mrb[8].mxu1 %vm578_vm5, %v3349_v57  ;;  %2617 = vmatpush3.bf16.msra.mxu0 %v1666_v62 }
  0x6b   : > { %2522 = vmatprep.mubr.msk.bf16.mxu1 %vm578_vm5, %v3355_v9  ;;  %2604 = vmatprep.mubr.msk.bf16.mxu0 %vm578_vm5, %v3337_v13 }
  0x6c   : > { %2791 = vmatprep.subr.msk.bf16.mxu0 %vm603_vm1, %v2355_v24 }
  0x71   : > { %2605 = vmatmul.mubr.msk.bf16.gmra.mrb[4].mxu0 %vm578_vm5, %v3349_v57 }
  0x72   : > { %2523 = vmatmul.mubr.msk.bf16.gmra.mrb[12].mxu1 %vm578_vm5, %v3371_v53  ;;  %2608 = vmatprep.mubr.msk.bf16.mxu0 %vm578_vm5, %v3355_v9 }
  0x73   : > { %2528 = vmatprep.mubr.msk.bf16.mxu1 %vm578_vm5, %v2287_v49 }
  0x79   : > { %2609 = vmatmul.mubr.msk.bf16.gmra.mrb[8].mxu0 %vm578_vm5, %v3371_v53 }
  0x7a   : > { %2529 = vmatmul.mubr.msk.bf16.vlgmr.msra.gmra.mrb[0].mxu1 %vm578_vm5, %v3150_v36  ;;  %2612 = vmatprep.mubr.msk.bf16.mxu0 %vm578_vm5, %v3382_v58  ;;  %v1228_v36 = vshrl.u32 %v3283_v60, 16  ;;  %v1649_v60 = vrot.slane %v1647_v56, 4 }
  0x7b   : > { %2545 = vmatpush3.bf16.msra.mxu1 %v1112_v34  ;;  %2532 = vmatprep.mubr.msk.bf16.mxu1 %vm578_vm5, %v3182_v1 }
  0x7c   : > { %2787 = vmatprep.subr.msk.bf16.mxu1 %vm603_vm1, %v2973_v2  ;;  %v1237_v2 = vshll.u32 %v3260_v51, 16  ;;  %v1230_v42 = vrot.slane %v1228_v36, 4  ;;  %v1643_v51 = vshll.u32 %v3395_v16, 16 }
  0x7e   : > { %v1239_v48 = vrot.slane %v1237_v2, 5  ;;  %v1645_v27 = vrot.slane %v1643_v51, 5 }
  0x80   : > { %v1244_v63 = vor.u32 %v1243_v54, %v1239_v48  ;;  %v1650_v26 = vor.u32 %v1649_v60, %v1645_v27 }
  0x81   : > { %2613 = vmatmul.mubr.msk.bf16.gmra.mrb[12].mxu0 %vm578_vm5, %v2335_v21 }
  0x82   : > { %2533 = vmatmul.mubr.msk.bf16.gmra.mrb[4].mxu1 %vm578_vm5, %v3223_v55  ;;  %2618 = vmatprep.mubr.msk.bf16.mxu0 %vm578_vm5, %v3090_v45  ;;  %v1634_v45 = vshrl.u32 %v3392_v40, 16  ;;  %v1245_v18 = vrot.slane %v1244_v63, 4  ;;  %v1651_v5 = vrot.slane %v1650_v26, 4 }
  0x83   : > { %2536 = vmatprep.mubr.msk.bf16.mxu1 %vm578_vm5, %v3254_v20 }
  0x84   : > { %v1636_v12 = vrot.slane %v1634_v45, 4  ;;  %v1250_v7 = vsel %vm3025_vm4, %v1245_v18, %v1249_v19  ;;  %v1656_v29 = vsel %vm3025_vm4, %v1651_v5, %v1655_v6 }
  0x89   : > { %2619 = vmatmul.mubr.msk.bf16.vlgmr.msra.gmra.mrb[0].mxu0 %vm578_vm5, %v3120_v10  ;;  %v1234_v10 = vor.u32 %v1233_v47, %v1230_v42 }
  0x8a   : > { %2537 = vmatmul.mubr.msk.bf16.gmra.mrb[8].mxu1 %vm578_vm5, %v3264_v44  ;;  %2635 = vmatpush3.bf16.msra.mxu0 %v1798_v38 }
  0x8b   : > { %2540 = vmatprep.mubr.msk.bf16.mxu1 %vm578_vm5, %v3293_v17  ;;  %2622 = vmatprep.mubr.msk.bf16.mxu0 %vm578_vm5, %v3148_v35  ;;  %v1235_v43 = vrot.slane %v1234_v10, 4  ;;  %v1640_v35 = vor.u32 %v1639_v46, %v1636_v12 }
  0x8d   : > { %v1240_v32 = vsel %vm3025_vm4, %v1235_v43, %v1239_v48  ;;  %v1641_v28 = vrot.slane %v1640_v35, 4 }
  0x8e   : > { %v2314_v15 = vcombine.low %v1240_v32, %v1250_v7 }
  0x91   : > { %2623 = vmatmul.mubr.msk.bf16.gmra.mrb[4].mxu0 %vm578_vm5, %v3196_v22 }
  0x92   : > { %2541 = vmatmul.mubr.msk.bf16.gmra.mrb[12].mxu1 %vm578_vm5, %v3299_v25  ;;  %2626 = vmatprep.mubr.msk.bf16.mxu0 %vm578_vm5, %v3225_v59 }
  0x93   : > { %2546 = vmatprep.mubr.msk.bf16.mxu1 %vm578_vm5, %v3291_v61  ;;  %v1646_v61 = vsel %vm3025_vm4, %v1641_v28, %v1645_v27 }
  0x94   : > { %v2345_v30 = vcombine.low %v1646_v61, %v1656_v29 }
  0x99   : > { %2627 = vmatmul.mubr.msk.bf16.gmra.mrb[8].mxu0 %vm578_vm5, %v3262_v52 }
  0x9a   : > { %2547 = vmatmul.mubr.msk.bf16.vlgmr.msra.gmra.mrb[0].mxu1 %vm578_vm5, %v3305_v14  ;;  %2630 = vmatprep.mubr.msk.bf16.mxu0 %vm578_vm5, %v2314_v15 }
  0x9b   : > { %2653 = vmatpush3.bf16.msra.mxu1 %v2981_v4  ;;  %2550 = vmatprep.mubr.msk.bf16.mxu1 %vm578_vm5, %v3333_v37  ;;  %v1784_v4 = vrot.slane %v3395_v16, 5 }
  0xa1   : > { %2631 = vmatmul.mubr.msk.bf16.gmra.mrb[12].mxu0 %vm578_vm5, %v2345_v30 }
  0xa2   : > { %2551 = vmatmul.mubr.msk.bf16.gmra.mrb[4].mxu1 %vm578_vm5, %v3337_v13  ;;  %2636 = vmatprep.mubr.msk.bf16.mxu0 %vm578_vm5, %v3182_v1  ;;  %v1786_v1 = vrot.slane %v1784_v4, 4 }
  0xa3   : > { %2554 = vmatprep.mubr.msk.bf16.mxu1 %vm578_vm5, %v3349_v57 }
  0xa9   : > { %2637 = vmatmul.mubr.msk.bf16.vlgmr.msra.gmra.mrb[0].mxu0 %vm578_vm5, %v3223_v55  ;;  %v1787_v55 = vrot.slane %v355_v23, 5 }
  0xaa   : > { %2555 = vmatmul.mubr.msk.bf16.gmra.mrb[8].mxu1 %vm578_vm5, %v3355_v9  ;;  %2640 = vmatprep.mubr.msk.bf16.mxu0 %vm578_vm5, %v3254_v20  ;;  %v1785_v20 = vsel %vm3114_vm8, %v2354_v31, %v1784_v4 }
  0xab   : > { %2558 = vmatprep.mubr.msk.bf16.mxu1 %vm578_vm5, %v3371_v53 }
  0xb1   : > { %2641 = vmatmul.mubr.msk.bf16.gmra.mrb[4].mxu0 %vm578_vm5, %v3264_v44  ;;  %v1788_v44 = vsel %vm3114_vm8, %v1786_v1, %v1787_v55 }
  0xb2   : > { %2559 = vmatmul.mubr.msk.bf16.gmra.mrb[12].mxu1 %vm578_vm5, %v3382_v58  ;;  %2644 = vmatprep.mubr.msk.bf16.mxu0 %vm578_vm5, %v3293_v17 }
  0xb3   : > { %2572 = vmatprep.mubr.msk.bf16.mxu1 %vm578_vm5, %v3196_v22  ;;  %v2356_v22 = vcombine.low %v1785_v20, %v1788_v44 }
  0xb9   : > { %2645 = vmatmul.mubr.msk.bf16.gmra.mrb[8].mxu0 %vm578_vm5, %v3299_v25 }
  0xba   : > { %2573 = vmatmul.mubr.msk.bf16.vlgmr.msra.gmra.mrb[8].mxu1 %vm578_vm5, %v3225_v59  ;;  %2648 = vmatprep.mubr.msk.bf16.mxu0 %vm578_vm5, %v3329_v33 }
  0xbb   : > { %2576 = vmatprep.mubr.msk.bf16.mxu1 %vm578_vm5, %v3262_v52 }
  0xc1   : > { %2649 = vmatmul.mubr.msk.bf16.gmra.mrb[12].mxu0 %vm578_vm5, %v2356_v22 }
  0xc2   : > { %2577 = vmatmul.mubr.msk.bf16.gmra.mrb[12].mxu1 %vm578_vm5, %v2314_v15 }
 0x16d   : > { %v2548_v59 = vpop.f32.mrb[0].mxu1 }
 0x16e   : > { %v1148_v17 = vpop.f32.mrb[1].mxu1 }
 0x16f   : > { %v2549_v25 = vpop.f32.mrb[2].mxu1 }
 0x170   : > { %v1151_v14 = vpop.f32.mrb[3].mxu1 }
 0x175   : > { %v2552_v0 = vpop.f32.mrb[4].mxu1 }
 0x176   : > { %v1164_v39 = vpop.f32.mrb[5].mxu1 }
 0x177   : > { %v2553_v49 = vpop.f32.mrb[6].mxu1 }
 0x178   : > { %v1167_v52 = vpop.f32.mrb[7].mxu1 }
 0x17c   : > { %v2638_v33 = vpop.f32.mrb[0].mxu0 }
 0x17d   : > { %v2654_v37 = vadd.f32 %v2638_v33, %v2548_v59  ;;  %v1834_v13 = vpop.f32.mrb[1].mxu0 }
 0x17e   : > { %v2655_v57 = vadd.f32 %v1834_v13, %v1148_v17  ;;  %v2639_v62 = vpop.f32.mrb[2].mxu0 }
 0x17f   : > { %v2393_v9 = vpack.c.bf16 %v2654_v37, %v2654_v37  ;;  %v2656_v24 = vadd.f32 %v2639_v62, %v2549_v25  ;;  %v1837_v53 = vpop.f32.mrb[3].mxu0  ;;  %v2039_v16 = vmul.f32 %v2654_v37, %v2654_v37  ;;  %v1999_v47 = vsel %vm1995_vm10, %v2654_v37, 0.0 }
 0x180   : > { %v2391_v58 = vpack.c.bf16 %v2655_v57, %v2655_v57  ;;  %v2037_v34 = vmul.f32 %v2655_v57, %v2655_v57  ;;  %v2657_v40 = vadd.f32 %v1837_v53, %v1151_v14  ;;  %v1996_v36 = vsel %vm1995_vm10, %v2655_v57, 0.0 }
 0x181   : > { %1980 = vst.msk [vmem:[%s2965_s28 + $0x8] sm:$0xf] %vm1977_vm9, %v2393_v9  ;;  %v2394_v21 = vpack.c.bf16 %v2656_v24, %v2656_v24  ;;  %v2040_v38 = vmul.f32 %v2656_v24, %v2656_v24  ;;  %v2056_v63 = vsel %vm1995_vm10, %v2039_v16, 0.0  ;;  %v2001_v46 = vsel %vm1995_vm10, %v2656_v24, 0.0 }
 0x182   : > { %1978 = vst.msk [vmem:[%s2965_s28] sm:$0xf] %vm1977_vm9, %v2391_v58  ;;  %v2392_v41 = vpack.c.bf16 %v2657_v40, %v2657_v40  ;;  %v1997_v2 = vsel %vm1995_vm10, %v2657_v40, 0.0  ;;  %v2038_v8 = vmul.f32 %v2657_v40, %v2657_v40  ;;  %v2053_v48 = vsel %vm1995_vm10, %v2037_v34, 0.0 }
 0x183   : > { %1981 = vst.msk [vmem:[%s2965_s28 + $0xc] sm:$0xf] %vm1977_vm9, %v2394_v21  ;;  %v1998_v42 = vadd.f32 %v1997_v2, %v1996_v36  ;;  %v2058_v27 = vsel %vm1995_vm10, %v2040_v38, 0.0 }
 0x184   : > { %1979 = vst.msk [vmem:[%s2965_s28 + $0x4] sm:$0xf] %vm1977_vm9, %v2392_v41  ;;  %v2054_v54 = vsel %vm1995_vm10, %v2038_v8, 0.0  ;;  %v2642_v45 = vpop.f32.mrb[4].mxu0 }
 0x185   : > { %v2000_v50 = vadd.f32 %v1999_v47, %v1998_v42  ;;  %v2055_v56 = vadd.f32 %v2054_v54, %v2053_v48  ;;  %v2658_v51 = vadd.f32 %v2642_v45, %v2552_v0  ;;  %v1850_v10 = vpop.f32.mrb[5].mxu0 }
 0x186   : > { %v2659_v3 = vadd.f32 %v1850_v10, %v1164_v39  ;;  %v2643_v12 = vpop.f32.mrb[6].mxu0 }
 0x187   : > { %v2057_v60 = vadd.f32 %v2056_v63, %v2055_v56  ;;  %v2397_v43 = vpack.c.bf16 %v2658_v51, %v2658_v51  ;;  %v1853_v18 = vpop.f32.mrb[7].mxu0  ;;  %v2002_v23 = vadd.f32 %v2001_v46, %v2000_v50  ;;  %v2660_v32 = vadd.f32 %v2643_v12, %v2553_v49 }
 0x188   : > { %v2395_v19 = vpack.c.bf16 %v2659_v3, %v2659_v3  ;;  %v2003_v35 = vsel %vm1995_vm10, %v2659_v3, 0.0  ;;  %v2041_v26 = vmul.f32 %v2659_v3, %v2659_v3  ;;  %v2661_v7 = vadd.f32 %v1853_v18, %v1167_v52 }
 0x189   : > { %1984 = vst.msk [vmem:[%s2965_s28 + $0x18] sm:$0xf] %vm1977_vm9, %v2397_v43  ;;  %v2059_v11 = vadd.f32 %v2058_v27, %v2057_v60  ;;  %v2004_v15 = vadd.f32 %v2003_v35, %v2002_v23  ;;  %v2398_v6 = vpack.c.bf16 %v2660_v32, %v2660_v32  ;;  %v2043_v61 = vmul.f32 %v2658_v51, %v2658_v51 }
 0x18a   : > { %1982 = vst.msk [vmem:[%s2965_s28 + $0x10] sm:$0xf] %vm1977_vm9, %v2395_v19  ;;  %v2060_v28 = vsel %vm1995_vm10, %v2041_v26, 0.0  ;;  %v2396_v29 = vpack.c.bf16 %v2661_v7, %v2661_v7  ;;  %v2005_v30 = vsel %vm1995_vm10, %v2661_v7, 0.0  ;;  %v2042_v4 = vmul.f32 %v2661_v7, %v2661_v7 }
 0x18b   : > { %v2061_v5 = vadd.f32 %v2060_v28, %v2059_v11  ;;  %1985 = vst.msk [vmem:[%s2965_s28 + $0x1c] sm:$0xf] %vm1977_vm9, %v2398_v6  ;;  %v2006_v1 = vadd.f32 %v2005_v30, %v2004_v15  ;;  %v2007_v44 = vsel %vm1995_vm10, %v2658_v51, 0.0  ;;  %v2044_v22 = vmul.f32 %v2660_v32, %v2660_v32 }
 0x18c   : > { %v2646_v31 = vpop.f32.mrb[8].mxu0  ;;  %1983 = vst.msk [vmem:[%s2965_s28 + $0x14] sm:$0xf] %vm1977_vm9, %v2396_v29  ;;  %v2062_v59 = vsel %vm1995_vm10, %v2042_v4, 0.0  ;;  %v2064_v37 = vsel %vm1995_vm10, %v2043_v61, 0.0  ;;  %v2009_v13 = vsel %vm1995_vm10, %v2660_v32, 0.0 }
 0x18d   : > { %v2574_v55 = vpop.f32.mrb[8].mxu1  ;;  %v1866_v20 = vpop.f32.mrb[9].mxu0  ;;  %v2008_v0 = vadd.f32 %v2007_v44, %v2006_v1  ;;  %v2063_v39 = vadd.f32 %v2062_v59, %v2061_v5  ;;  %v2066_v40 = vsel %vm1995_vm10, %v2044_v22, 0.0 }
 0x18e   : > { %v2662_v17 = vadd.f32 %v2646_v31, %v2574_v55  ;;  %v1328_v25 = vpop.f32.mrb[9].mxu1  ;;  %v2647_v14 = vpop.f32.mrb[10].mxu0 }
 0x18f   : > { %v2663_v49 = vadd.f32 %v1866_v20, %v1328_v25  ;;  %v2575_v52 = vpop.f32.mrb[10].mxu1  ;;  %v1869_v33 = vpop.f32.mrb[11].mxu0  ;;  %v2065_v24 = vadd.f32 %v2064_v37, %v2063_v39  ;;  %v2010_v58 = vadd.f32 %v2009_v13, %v2008_v0 }
 0x190   : > { %v2401_v57 = vpack.c.bf16 %v2662_v17, %v2662_v17  ;;  %v2664_v62 = vadd.f32 %v2647_v14, %v2575_v52  ;;  %v1331_v9 = vpop.f32.mrb[11].mxu1  ;;  %v2047_v36 = vmul.f32 %v2662_v17, %v2662_v17  ;;  %v2015_v12 = vsel %vm1995_vm10, %v2662_v17, 0.0 }
 0x191   : > { %v2399_v53 = vpack.c.bf16 %v2663_v49, %v2663_v49  ;;  %v2011_v34 = vsel %vm1995_vm10, %v2663_v49, 0.0  ;;  %v2045_v16 = vmul.f32 %v2663_v49, %v2663_v49  ;;  %v2067_v2 = vadd.f32 %v2066_v40, %v2065_v24 }
 0x192   : > { %1988 = vst.msk [vmem:[%s2965_s28 + $0x28] sm:$0xf] %vm1977_vm9, %v2401_v57  ;;  %v2402_v21 = vpack.c.bf16 %v2664_v62, %v2664_v62  ;;  %v2012_v41 = vadd.f32 %v2011_v34, %v2010_v58  ;;  %v2665_v8 = vadd.f32 %v1869_v33, %v1331_v9  ;;  %v2072_v46 = vsel %vm1995_vm10, %v2047_v36, 0.0 }
 0x193   : > { %1986 = vst.msk [vmem:[%s2965_s28 + $0x20] sm:$0xf] %vm1977_vm9, %v2399_v53  ;;  %v2068_v38 = vsel %vm1995_vm10, %v2045_v16, 0.0  ;;  %v2048_v18 = vmul.f32 %v2664_v62, %v2664_v62  ;;  %v2017_v11 = vsel %vm1995_vm10, %v2664_v62, 0.0 }
 0x194   : > { %1989 = vst.msk [vmem:[%s2965_s28 + $0x2c] sm:$0xf] %vm1977_vm9, %v2402_v21  ;;  %v2650_v42 = vpop.f32.mrb[12].mxu0  ;;  %v2069_v47 = vadd.f32 %v2068_v38, %v2067_v2  ;;  %v2400_v48 = vpack.c.bf16 %v2665_v8, %v2665_v8  ;;  %v2013_v54 = vsel %vm1995_vm10, %v2665_v8, 0.0  ;;  %v2046_v51 = vmul.f32 %v2665_v8, %v2665_v8 }
 0x195   : > { %v2578_v45 = vpop.f32.mrb[12].mxu1  ;;  %v1882_v50 = vpop.f32.mrb[13].mxu0  ;;  %v2014_v56 = vadd.f32 %v2013_v54, %v2012_v41  ;;  %v2074_v30 = vsel %vm1995_vm10, %v2048_v18, 0.0  ;;  %v1994_v41 = vld [vmem:[#allocation2] sm:$0x1] }
 0x196   : > { %v2666_v10 = vadd.f32 %v2650_v42, %v2578_v45  ;;  %v1344_v63 = vpop.f32.mrb[13].mxu1  ;;  %v2651_v3 = vpop.f32.mrb[14].mxu0  ;;  %1987 = vst.msk [vmem:[%s2965_s28 + $0x24] sm:$0xf] %vm1977_vm9, %v2400_v48  ;;  %v2070_v23 = vsel %vm1995_vm10, %v2046_v51, 0.0 }
 0x197   : > { %v2667_v27 = vadd.f32 %v1882_v50, %v1344_v63  ;;  %v2579_v60 = vpop.f32.mrb[14].mxu1  ;;  %v1885_v43 = vpop.f32.mrb[15].mxu0  ;;  %v2016_v19 = vadd.f32 %v2015_v12, %v2014_v56  ;;  %v2071_v32 = vadd.f32 %v2070_v23, %v2069_v47  ;;  %v2036_v47 = vld [vmem:[#allocation3] sm:$0x1] }
 0x198   : > { %v2405_v35 = vpack.c.bf16 %v2666_v10, %v2666_v10  ;;  %v1347_v26 = vpop.f32.mrb[15].mxu1  ;;  %v2668_v6 = vadd.f32 %v2651_v3, %v2579_v60  ;;  %v2051_v22 = vmul.f32 %v2666_v10, %v2666_v10  ;;  %v2023_v25 = vsel %vm1995_vm10, %v2666_v10, 0.0 }
 0x199   : > { %v2403_v7 = vpack.c.bf16 %v2667_v27, %v2667_v27  ;;  %v2019_v15 = vsel %vm1995_vm10, %v2667_v27, 0.0  ;;  %v2018_v28 = vadd.f32 %v2017_v11, %v2016_v19  ;;  %v2049_v5 = vmul.f32 %v2667_v27, %v2667_v27 }
 0x19a   : > { %1992 = vst.msk [vmem:[%s2965_s28 + $0x38] sm:$0xf] %vm1977_vm9, %v2405_v35  ;;  %v2669_v61 = vadd.f32 %v1885_v43, %v1347_v26  ;;  %v2073_v29 = vadd.f32 %v2072_v46, %v2071_v32  ;;  %v2406_v1 = vpack.c.bf16 %v2668_v6, %v2668_v6  ;;  %v2052_v0 = vmul.f32 %v2668_v6, %v2668_v6 }
 0x19b   : > { %1990 = vst.msk [vmem:[%s2965_s28 + $0x30] sm:$0xf] %vm1977_vm9, %v2403_v7  ;;  %v2020_v4 = vadd.f32 %v2019_v15, %v2018_v28  ;;  %v2076_v31 = vsel %vm1995_vm10, %v2049_v5, 0.0  ;;  %v2025_v52 = vsel %vm1995_vm10, %v2668_v6, 0.0  ;;  %v2080_v37 = vsel %vm1995_vm10, %v2051_v22, 0.0 }
 0x19c   : > { %v2075_v55 = vadd.f32 %v2074_v30, %v2073_v29  ;;  %v2404_v20 = vpack.c.bf16 %v2669_v61, %v2669_v61  ;;  %v2021_v44 = vsel %vm1995_vm10, %v2669_v61, 0.0  ;;  %1993 = vst.msk [vmem:[%s2965_s28 + $0x3c] sm:$0xf] %vm1977_vm9, %v2406_v1  ;;  %v2050_v17 = vmul.f32 %v2669_v61, %v2669_v61 }
 0x19d   : > { %v2022_v59 = vadd.f32 %v2021_v44, %v2020_v4  ;;  %v2082_v62 = vsel %vm1995_vm10, %v2052_v0, 0.0 }
 0x19e   : > { %v2077_v14 = vadd.f32 %v2076_v31, %v2075_v55  ;;  %1991 = vst.msk [vmem:[%s2965_s28 + $0x34] sm:$0xf] %vm1977_vm9, %v2404_v20  ;;  %v2078_v49 = vsel %vm1995_vm10, %v2050_v17, 0.0 }
 0x19f   : > { %v2024_v39 = vadd.f32 %v2023_v25, %v2022_v59 }
 0x1a0   : > { %v2079_v33 = vadd.f32 %v2078_v49, %v2077_v14 }
 0x1a1   : > { %v2026_v13 = vadd.f32 %v2025_v52, %v2024_v39 }
 0x1a2   : > { %v2081_v57 = vadd.f32 %v2080_v37, %v2079_v33 }
 0x1a3   : > { %v2027_v9 = vrot.slane %v2026_v13, 4 }
 0x1a4   : > { %v2083_v24 = vadd.f32 %v2082_v62, %v2081_v57 }
 0x1a5   : > { %v2028_v53 = vadd.f32 %v2027_v9, %v2026_v13 }
 0x1a6   : > { %v2084_v58 = vrot.slane %v2083_v24, 4 }
 0x1a7   : > { %v2029_v34 = vrot.slane %v2028_v53, 2 }
 0x1a8   : > { %v2085_v40 = vadd.f32 %v2084_v58, %v2083_v24 }
 0x1a9   : > { %v2030_v16 = vadd.f32 %v2029_v34, %v2028_v53 }
 0x1aa   : > { %v2086_v21 = vrot.slane %v2085_v40, 2 }
 0x1ab   : > { %v2031_v36 = vrot.slane %v2030_v16, 1 }
 0x1ac   : > { %v2087_v2 = vadd.f32 %v2086_v21, %v2085_v40 }
 0x1ad   : > { %v2032_v8 = vadd.f32 %v2031_v36, %v2030_v16 }
 0x1ae   : > { %v2088_v38 = vrot.slane %v2087_v2, 1  ;;  %2097 = sbr.rel (%p3494_p0) target bundleno = 446 (0x1be), region = 40 }
 0x1af   : > { %v2033_v42 = vadd.f32 %v2032_v8, %v1994_v41 }
 0x1b0   : > { %v2089_v48 = vadd.f32 %v2088_v38, %v2087_v2 }
 0x1b1   : > { %2035 = vst.msk [vmem:[#allocation2] sm:$0x1] %vm2034_vm11, %v2033_v42 }
 0x1b2   : > { %v2090_v54 = vadd.f32 %v2089_v48, %v2036_v47 }
 0x1b4   : > { %2091 = vst.msk [vmem:[#allocation3] sm:$0x1] %vm2034_vm11, %v2090_v54 }
 0x1b8   : > { %v2098_v45 = vld [vmem:[#allocation2] sm:$0x1] }
 0x1bb   : > { %v2381_v50 = vld [vmem:[#allocation3] ss:$0 sm:$0xff] }
 0x1bc   : > { %v2107_v56 = vsel %vm2106_vm12, %v2098_v45, %v2381_v50 }
 0x1bd   : > { %2109 = vst.msk [vmem:[%s3586_s4] sm:$0x3] %vm2108_vm13, %v2107_v56 }
 0x1be PF: > { %s15_s19 = sadd.s32 1, %s2884_s19   ;;  %s3592_s15 = smov %s2876_s17 }
 0x1bf   : > { %p12_p1 = scmp.ge.s32.totalorder %s15_s19, 6   ;;  %s3593_s16 = smov %s2880_s18 }
 0x1c0   : > { %s3594_s17 = smov %s3597_s20  ;;  %s3595_s18 = smov %s3601_s21 }
 0x1c1   :  { %14 = sbr.rel (!%p12_p1) target bundleno = 3 (0x3), region = 89 }

</bundles_post_ra>
